<compile_context>
chip_gen: v7x
topology: tpu7x:2x2x1
jax: 0.10.0
libtpu: 0.0.40
codegen_flags: <defaults>
</compile_context>

<pallas_src>
import functools

import jax
import jax.numpy as jnp
from jax.experimental import pallas as pl
from jax.experimental.pallas import tpu as pltpu

_SUBLANE = 16  # batch-tile alignment (bf16 packs 16 rows per vreg)


def _round_up(n, m):
    return ((n + m - 1) // m) * m


def _cdiv(a, b):
    return (a + b - 1) // b


def _pad_to(arr, shape):
    pads = [(0, t - s) for s, t in zip(arr.shape, shape)]
    return jnp.pad(arr, pads)


def _dqn_kernel(x_ref, w1_ref, b1_ref, w2_ref, b2_ref, w3_ref, b3_ref, o_ref):
    """Fused (Linear -> ReLU) x2 -> Linear for one batch tile.

    Weights/biases use constant index_maps, so they stay VMEM-resident across
    all grid steps; matmuls run bf16 on the MXU with f32 accumulation, and the
    elementwise bias/ReLU work happens on the f32 accumulator (v5e VPU safe).
    """
    w2 = w2_ref[...]
    w3 = w3_ref[...]

    h1 = jnp.dot(x_ref[...], w1_ref[...], preferred_element_type=jnp.float32) + b1_ref[...]
    h1 = jnp.maximum(h1, 0.0)

    h2 = jnp.dot(h1.astype(w2.dtype), w2, preferred_element_type=jnp.float32) + b2_ref[...]
    h2 = jnp.maximum(h2, 0.0)

    out = jnp.dot(h2.astype(w3.dtype), w3, preferred_element_type=jnp.float32) + b3_ref[...]
    o_ref[...] = out.astype(o_ref.dtype)


def init_params(key, state_size, action_size, hidden=16):
    """PyTorch nn.Linear default init: U(-1/sqrt(fan_in), 1/sqrt(fan_in)).

    Weights stored [in, out] (transpose of nn.Linear), biases [1, out]."""
    def linear(k, fan_in, fan_out):
        kw, kb = jax.random.split(k)
        bound = 1.0 / jnp.sqrt(jnp.float32(fan_in))
        w = jax.random.uniform(kw, (fan_in, fan_out), jnp.float32, -bound, bound)
        b = jax.random.uniform(kb, (1, fan_out), jnp.float32, -bound, bound)
        return w, b

    k1, k2, k3 = jax.random.split(key, 3)
    w1, b1 = linear(k1, state_size, hidden)
    w2, b2 = linear(k2, hidden, hidden)
    w3, b3 = linear(k3, hidden, action_size)
    return w1, b1, w2, b2, w3, b3


def prepare_params(w1, b1, w2, b2, w3, b3, *, compute_dtype=jnp.bfloat16):
    """Pad feature dims (hidden -> 128 lanes, action -> multiple of 8) and cast
    weights to the MXU compute dtype.  Call ONCE (after init / after each
    optimizer step), not inside the per-forward hot path."""
    state_size, hidden = w1.shape
    action_size = w3.shape[1]
    h_pad = _round_up(hidden, 128)
    a_pad = _round_up(action_size, 8)  # compact output slab (not 128-wide)

    w1p = _pad_to(w1, (state_size, h_pad)).astype(compute_dtype)
    b1p = _pad_to(b1, (1, h_pad)).astype(jnp.float32)
    w2p = _pad_to(w2, (h_pad, h_pad)).astype(compute_dtype)
    b2p = _pad_to(b2, (1, h_pad)).astype(jnp.float32)
    w3p = _pad_to(w3, (h_pad, a_pad)).astype(compute_dtype)
    b3p = _pad_to(b3, (1, a_pad)).astype(jnp.float32)
    return (w1p, b1p, w2p, b2p, w3p, b3p)


@functools.partial(
    jax.jit, static_argnames=("action_size", "block_batch", "split_threshold")
)
def dqn_forward(x, padded_params, *, action_size, block_batch=1024, split_threshold=256):
    """Q = DQN(x).  x: [batch, state_size] f32; returns [batch, action_size] f32."""
    w1p, b1p, w2p, b2p, w3p, b3p = padded_params
    batch, state_size = x.shape
    h_pad = w1p.shape[1]
    a_pad = w3p.shape[1]
    compute_dtype = w1p.dtype

    # Balanced batch tiles: near-equal, sublane-aligned tiles instead of
    # rounding the whole batch up to a multiple of block_batch.
    n_tiles = _cdiv(batch, block_batch)
    if n_tiles == 1 and batch >= split_threshold:
        # Medium replay batch in a single tile: split in two so the "parallel"
        # grid axis shards across both TensorCores on v7x.  Tiny acting
        # batches (grid=(1,)) are latency-bound and stay single-step.
        n_tiles = 2
    tile_b = _round_up(_cdiv(batch, n_tiles), _SUBLANE)
    padded_batch = n_tiles * tile_b

    xp = _pad_to(x.astype(compute_dtype), (padded_batch, state_size))

    # Advisory cost estimate from the post-optimization padded dims.
    flops = 2 * padded_batch * (state_size * h_pad + h_pad * h_pad + h_pad * a_pad)
    bytes_accessed = (
        xp.size * xp.dtype.itemsize
        + sum(p.size * p.dtype.itemsize for p in padded_params)
        + padded_batch * a_pad * 4
    )

    # Weights/biases: constant index_map -> loaded to VMEM once, resident
    # across every grid step.
    const = lambda shape: pl.BlockSpec(shape, lambda i: (0, 0))

    out = pl.pallas_call(
        _dqn_kernel,
        out_shape=jax.ShapeDtypeStruct((padded_batch, a_pad), jnp.float32),
        grid=(n_tiles,),
        in_specs=[
            pl.BlockSpec((tile_b, state_size), lambda i: (i, 0)),
            const((state_size, h_pad)),
            const((1, h_pad)),
            const((h_pad, h_pad)),
            const((1, h_pad)),
            const((h_pad, a_pad)),
            const((1, a_pad)),
        ],
        out_specs=pl.BlockSpec((tile_b, a_pad), lambda i: (i, 0)),
        compiler_params=pltpu.CompilerParams(
            # Only affects codegen/sharding on multi-TC chips (v7x); on
            # single-TC v5e/v6e the grid is a serial loop either way.
            dimension_semantics=("parallel",),
        ),
        cost_estimate=pl.CostEstimate(
            flops=flops, transcendentals=0, bytes_accessed=bytes_accessed
        ),
    )(xp, w1p, b1p, w2p, b2p, w3p, b3p)

    return out[:batch, :action_size]


def reference_forward_matched(x, w1, b1, w2, b2, w3, b3, compute_dtype=jnp.bfloat16):
    """Pure-JAX reference mirroring the kernel's precision (bf16 matmuls, f32 acc)."""
    cd = compute_dtype
    h = jnp.dot(x.astype(cd), w1.astype(cd), preferred_element_type=jnp.float32) + b1
    h = jnp.maximum(h, 0.0)
    h = jnp.dot(h.astype(cd), w2.astype(cd), preferred_element_type=jnp.float32) + b2
    h = jnp.maximum(h, 0.0)
    return jnp.dot(h.astype(cd), w3.astype(cd), preferred_element_type=jnp.float32) + b3


def reference_forward_f32(x, w1, b1, w2, b2, w3, b3):
    h = jnp.maximum(x @ w1 + b1, 0.0)
    h = jnp.maximum(h @ w2 + b2, 0.0)
    return h @ w3 + b3


if __name__ == "__main__":
    state_size = 8
    action_size = 4
    hidden = 16

    key = jax.random.PRNGKey(0)
    kx, kp, kx2 = jax.random.split(key, 3)
    params = init_params(kp, state_size, action_size, hidden)
    padded_params = prepare_params(*params)  # pad + bf16 cast once, outside hot path

    # Small online-acting batch: single grid step.
    batch = 2
    x = jax.random.normal(kx, (batch, state_size), dtype=jnp.float32)
    out = jax.block_until_ready(dqn_forward(x, padded_params, action_size=action_size))
    ref = reference_forward_matched(x, *params)
    ref32 = reference_forward_f32(x, *params)
    assert out.shape == (batch, action_size)
    assert jnp.allclose(out, ref, atol=1e-2, rtol=1e-2), "mismatch vs precision-matched ref"
    assert jnp.allclose(out, ref32, atol=5e-2, rtol=5e-2), "mismatch vs f32 ref"

    # Replay-style batch: balanced 2-tile grid (2 x 160 rows), both TCs on v7x.
    batch2 = 300
    x2 = jax.random.normal(kx2, (batch2, state_size), dtype=jnp.float32)
    out2 = jax.block_until_ready(dqn_forward(x2, padded_params, action_size=action_size))
    ref2 = reference_forward_matched(x2, *params)
    assert out2.shape == (batch2, action_size)
    assert jnp.allclose(out2, ref2, atol=1e-2, rtol=1e-2), "mismatch vs ref (big batch)"

    print("KERNEL_OK")
</pallas_src>

<mosaic_0001>
module attributes {stable_mosaic.version = 11 : i64} {
  func.func @_dqn_kernel(%arg0: i32, %arg1: memref<16x8xbf16, #tpu.memory_space<vmem>>, %arg2: memref<8x128xbf16, #tpu.memory_space<vmem>>, %arg3: memref<1x128xf32, #tpu.memory_space<vmem>>, %arg4: memref<128x128xbf16, #tpu.memory_space<vmem>>, %arg5: memref<1x128xf32, #tpu.memory_space<vmem>>, %arg6: memref<128x8xbf16, #tpu.memory_space<vmem>>, %arg7: memref<1x8xf32, #tpu.memory_space<vmem>>, %arg8: memref<16x8xf32, #tpu.memory_space<vmem>>) attributes {dimension_semantics = [#tpu.dimension_semantics<parallel>], iteration_bounds = array<i64: 1>, scalar_prefetch = 0 : i64, scratch_operands = 0 : i64, tpu.core_type = #tpu.core_type<tc>, window_params = [{transform_indices = @transform_0, window_bounds = array<i64: 16, 8>}, {pipeline_mode = #tpu.pipeline_mode<synchronous>, transform_indices = @transform_1, window_bounds = array<i64: 8, 128>}, {pipeline_mode = #tpu.pipeline_mode<synchronous>, transform_indices = @transform_2, window_bounds = array<i64: 1, 128>}, {pipeline_mode = #tpu.pipeline_mode<synchronous>, transform_indices = @transform_3, window_bounds = array<i64: 128, 128>}, {pipeline_mode = #tpu.pipeline_mode<synchronous>, transform_indices = @transform_4, window_bounds = array<i64: 1, 128>}, {pipeline_mode = #tpu.pipeline_mode<synchronous>, transform_indices = @transform_5, window_bounds = array<i64: 128, 8>}, {pipeline_mode = #tpu.pipeline_mode<synchronous>, transform_indices = @transform_6, window_bounds = array<i64: 1, 8>}, {transform_indices = @transform_7, window_bounds = array<i64: 16, 8>}]} {
    %c0 = arith.constant 0 : index
    %c0_0 = arith.constant 0 : index
    %0 = vector.load %arg4[%c0, %c0_0] : memref<128x128xbf16, #tpu.memory_space<vmem>>, vector<128x128xbf16>
    %c0_1 = arith.constant 0 : index
    %c0_2 = arith.constant 0 : index
    %1 = vector.load %arg6[%c0_1, %c0_2] : memref<128x8xbf16, #tpu.memory_space<vmem>>, vector<128x8xbf16>
    %c0_3 = arith.constant 0 : index
    %c0_4 = arith.constant 0 : index
    %2 = vector.load %arg1[%c0_3, %c0_4] : memref<16x8xbf16, #tpu.memory_space<vmem>>, vector<16x8xbf16>
    %c0_5 = arith.constant 0 : index
    %c0_6 = arith.constant 0 : index
    %3 = vector.load %arg2[%c0_5, %c0_6] : memref<8x128xbf16, #tpu.memory_space<vmem>>, vector<8x128xbf16>
    %cst = arith.constant dense<0.000000e+00> : vector<16x128xf32>
    %4 = tpu.matmul %2, %3, %cst {dimension_numbers = #tpu.dot_dimension_numbers<[1], [0], [0], [1], [0, 0, 1, 1], [], []>} : vector<16x8xbf16>, vector<8x128xbf16>, vector<16x128xf32> -> vector<16x128xf32>
    %c0_7 = arith.constant 0 : index
    %c0_8 = arith.constant 0 : index
    %5 = vector.load %arg3[%c0_7, %c0_8] : memref<1x128xf32, #tpu.memory_space<vmem>>, vector<1x128xf32>
    %6 = vector.broadcast %5 : vector<1x128xf32> to vector<16x128xf32>
    %7 = arith.addf %4, %6 : vector<16x128xf32>
    %cst_9 = arith.constant 0.000000e+00 : f32
    %8 = vector.broadcast %cst_9 : f32 to vector<16x128xf32>
    %9 = arith.maximumf %7, %8 : vector<16x128xf32>
    %10 = arith.truncf %9 : vector<16x128xf32> to vector<16x128xbf16>
    %cst_10 = arith.constant dense<0.000000e+00> : vector<16x128xf32>
    %11 = tpu.matmul %10, %0, %cst_10 {dimension_numbers = #tpu.dot_dimension_numbers<[1], [0], [0], [1], [0, 0, 1, 1], [], []>} : vector<16x128xbf16>, vector<128x128xbf16>, vector<16x128xf32> -> vector<16x128xf32>
    %c0_11 = arith.constant 0 : index
    %c0_12 = arith.constant 0 : index
    %12 = vector.load %arg5[%c0_11, %c0_12] : memref<1x128xf32, #tpu.memory_space<vmem>>, vector<1x128xf32>
    %13 = vector.broadcast %12 : vector<1x128xf32> to vector<16x128xf32>
    %14 = arith.addf %11, %13 : vector<16x128xf32>
    %cst_13 = arith.constant 0.000000e+00 : f32
    %15 = vector.broadcast %cst_13 : f32 to vector<16x128xf32>
    %16 = arith.maximumf %14, %15 : vector<16x128xf32>
    %17 = arith.truncf %16 : vector<16x128xf32> to vector<16x128xbf16>
    %cst_14 = arith.constant dense<0.000000e+00> : vector<16x8xf32>
    %18 = tpu.matmul %17, %1, %cst_14 {dimension_numbers = #tpu.dot_dimension_numbers<[1], [0], [0], [1], [0, 0, 1, 1], [], []>} : vector<16x128xbf16>, vector<128x8xbf16>, vector<16x8xf32> -> vector<16x8xf32>
    %c0_15 = arith.constant 0 : index
    %c0_16 = arith.constant 0 : index
    %19 = vector.load %arg7[%c0_15, %c0_16] : memref<1x8xf32, #tpu.memory_space<vmem>>, vector<1x8xf32>
    %20 = vector.broadcast %19 : vector<1x8xf32> to vector<16x8xf32>
    %21 = arith.addf %18, %20 : vector<16x8xf32>
    %c0_17 = arith.constant 0 : index
    %c0_18 = arith.constant 0 : index
    %22 = vector.load %arg8[%c0_17, %c0_18] : memref<16x8xf32, #tpu.memory_space<vmem>>, vector<16x8xf32>
    tpu.vector_store %arg8[%c0_17, %c0_18], %21 {strides = array<i32>} : memref<16x8xf32, #tpu.memory_space<vmem>>, vector<16x8xf32>,
    return
  }
  func.func @transform_0(%arg0: i32) -> (i32, i32) {
    %c0_i32 = arith.constant 0 : i32
    %c0_i32_0 = arith.constant 0 : i32
    return %arg0, %c0_i32 : i32, i32
  }
  func.func @transform_1(%arg0: i32) -> (i32, i32) {
    %c0_i32 = arith.constant 0 : i32
    %c0_i32_0 = arith.constant 0 : i32
    %c0_i32_1 = arith.constant 0 : i32
    return %c0_i32, %c0_i32_0 : i32, i32
  }
  func.func @transform_2(%arg0: i32) -> (i32, i32) {
    %c0_i32 = arith.constant 0 : i32
    %c0_i32_0 = arith.constant 0 : i32
    %c0_i32_1 = arith.constant 0 : i32
    return %c0_i32, %c0_i32_0 : i32, i32
  }
  func.func @transform_3(%arg0: i32) -> (i32, i32) {
    %c0_i32 = arith.constant 0 : i32
    %c0_i32_0 = arith.constant 0 : i32
    %c0_i32_1 = arith.constant 0 : i32
    return %c0_i32, %c0_i32_0 : i32, i32
  }
  func.func @transform_4(%arg0: i32) -> (i32, i32) {
    %c0_i32 = arith.constant 0 : i32
    %c0_i32_0 = arith.constant 0 : i32
    %c0_i32_1 = arith.constant 0 : i32
    return %c0_i32, %c0_i32_0 : i32, i32
  }
  func.func @transform_5(%arg0: i32) -> (i32, i32) {
    %c0_i32 = arith.constant 0 : i32
    %c0_i32_0 = arith.constant 0 : i32
    %c0_i32_1 = arith.constant 0 : i32
    return %c0_i32, %c0_i32_0 : i32, i32
  }
  func.func @transform_6(%arg0: i32) -> (i32, i32) {
    %c0_i32 = arith.constant 0 : i32
    %c0_i32_0 = arith.constant 0 : i32
    %c0_i32_1 = arith.constant 0 : i32
    return %c0_i32, %c0_i32_0 : i32, i32
  }
  func.func @transform_7(%arg0: i32) -> (i32, i32) {
    %c0_i32 = arith.constant 0 : i32
    %c0_i32_0 = arith.constant 0 : i32
    return %arg0, %c0_i32 : i32, i32
  }
}

</mosaic_0001>

<bundles_post_ra>
// kernel: dqn_forward.1
= control target key start
LH: loop header
LB: loop body
LE: loop exit
PB: predicated region body
PF: predicated region fallthrough
CT: control target
= control target key end

     0   :  { %vm78_vm0 = vcmask 1043456   ;;  %v433_v0 = vmov 0.0   ;;  %vm434_vm1 = vmmov 0   ;;  %vm74_vm2 = vcmask 64512   ;;  %s567_s1 = inlined_call_operand.vmem [shape: bf16[8,128], index: 1, kind: input, shape index: {}]   ;;  %s568_s0 = inlined_call_operand.vmem [shape: bf16[16,8], index: 0, kind: input, shape index: {}]   ;;  %s569_s3 = inlined_call_operand.vmem [shape: bf16[128,128], index: 3, kind: input, shape index: {}]   ;;  %s570_s5 = inlined_call_operand.vmem [shape: bf16[128,8], index: 5, kind: input, shape index: {}]   ;;  %s571_s2 = inlined_call_operand.vmem [shape: f32[1,128], index: 2, kind: input, shape index: {}]   ;;  %s572_s4 = inlined_call_operand.vmem [shape: f32[1,128], index: 4, kind: input, shape index: {}]   ;;  %s573_s6 = inlined_call_operand.vmem [shape: f32[1,8], index: 6, kind: input, shape index: {}]   ;;  %s574_s7 = inlined_call_operand.vmem [shape: f32[16,8], index: 7, kind: output, shape index: {}]  }
   0x1   :  { %368 = vmatprep.subr.bf16.mxu0 %v433_v0  ;;  %v61_v1 = vld [vmem:[%s567_s1] sm:$0xf]  ;;  %370 = vmatprep.mubr.msk.bf16.mxu0 %vm434_vm1, %v433_v0  ;;  %v418_v5 = vld [vmem:[%s569_s3 + $0x8] sm:$0xff]   ;;  %v419_v6 = vld [vmem:[%s569_s3 + $0x10] sm:$0xff]  }
   0x2   :  { %v80_v2 = vsel %vm78_vm0, %v61_v1, 0  ;;  %v416_v3 = vld [vmem:[%s568_s0] sm:$0xff]   ;;  %374 = vmatprep.subr.bf16.mxu1 %v433_v0  ;;  %390 = vmatprep.mubr.msk.bf16.mxu1 %vm434_vm1, %v433_v0  ;;  %v420_v7 = vld [vmem:[%s569_s3 + $0x18] sm:$0xff]   ;;  %v422_v9 = vld [vmem:[%s569_s3 + $0x28] sm:$0xff]  }
   0x3   :  { %369 = vmatpush3.bf16.msra.mxu0 %v80_v2  ;;  %v417_v4 = vld [vmem:[%s569_s3] sm:$0xff]   ;;  %v423_v10 = vld [vmem:[%s569_s3 + $0x30] sm:$0xff]   ;;  %v424_v11 = vld [vmem:[%s569_s3 + $0x38] sm:$0xff]  }
   0x4   :  { %394 = vmatprep.subr.bf16.mxu0 %v433_v0  ;;  %375 = vmatpush3.bf16.msra.mxu1 %v417_v4  ;;  %v421_v8 = vld [vmem:[%s569_s3 + $0x20] sm:$0xff]   ;;  %v426_v13 = vld [vmem:[%s570_s5 + $0x8] sm:$0xff]   ;;  %v427_v14 = vld [vmem:[%s570_s5 + $0x10] sm:$0xff]  }
   0x5   :  { %376 = vmatprep.subr.bf16.mxu1 %v433_v0  ;;  %v425_v12 = vld [vmem:[%s570_s5] sm:$0xff]   ;;  %v428_v15 = vld [vmem:[%s570_s5 + $0x18] sm:$0xff]   ;;  %v430_v17 = vld [vmem:[%s570_s5 + $0x28] sm:$0xff]  }
   0x6   :  { %371 = vmatmul.mubr.msk.bf16.vlgmr.msra.gmra.mrb[0].mxu0 %vm74_vm2, %v416_v3  ;;  %v429_v16 = vld [vmem:[%s570_s5 + $0x20] sm:$0xff]   ;;  %v431_v28 = vld [vmem:[%s570_s5 + $0x30] sm:$0xff]   ;;  %v432_v29 = vld [vmem:[%s570_s5 + $0x38] sm:$0xff]  }
   0x7   :  { %410 = vmatprep.mubr.msk.bf16.mxu0 %vm434_vm1, %v433_v0  ;;  %395 = vmatpush3.bf16.msra.mxu0 %v425_v12  ;;  %v327_v18 = vld [vmem:[%s571_s2] ss:$0 sm:$0xff] }
   0x8   :  { %377 = vmatpush3.bf16.msra.mxu1 %v418_v5  ;;  %396 = vmatprep.subr.bf16.mxu0 %v433_v0  ;;  %v330_v30 = vld [vmem:[%s572_s4] ss:$0 sm:$0xff] }
   0x9   :  { %378 = vmatprep.subr.bf16.mxu1 %v433_v0  ;;  %v339_v40 = vld [vmem:[%s573_s6] ss:$0 sm:$0xff] }
   0xb   :  { %397 = vmatpush3.bf16.msra.mxu0 %v426_v13 }
   0xc   :  { %379 = vmatpush3.bf16.msra.mxu1 %v419_v6  ;;  %398 = vmatprep.subr.bf16.mxu0 %v433_v0 }
   0xd   :  { %380 = vmatprep.subr.bf16.mxu1 %v433_v0 }
   0xf   :  { %399 = vmatpush3.bf16.msra.mxu0 %v427_v14 }
  0x10   :  { %381 = vmatpush3.bf16.msra.mxu1 %v420_v7  ;;  %400 = vmatprep.subr.bf16.mxu0 %v433_v0 }
  0x11   :  { %382 = vmatprep.subr.bf16.mxu1 %v433_v0 }
  0x13   :  { %401 = vmatpush3.bf16.msra.mxu0 %v428_v15 }
  0x14   :  { %383 = vmatpush3.bf16.msra.mxu1 %v421_v8  ;;  %402 = vmatprep.subr.bf16.mxu0 %v433_v0 }
  0x15   :  { %384 = vmatprep.subr.bf16.mxu1 %v433_v0 }
  0x17   :  { %403 = vmatpush3.bf16.msra.mxu0 %v429_v16 }
  0x18   :  { %385 = vmatpush3.bf16.msra.mxu1 %v422_v9  ;;  %404 = vmatprep.subr.bf16.mxu0 %v433_v0 }
  0x19   :  { %386 = vmatprep.subr.bf16.mxu1 %v433_v0 }
  0x1b   :  { %405 = vmatpush3.bf16.msra.mxu0 %v430_v17 }
  0x1c   :  { %387 = vmatpush3.bf16.msra.mxu1 %v423_v10  ;;  %406 = vmatprep.subr.bf16.mxu0 %v433_v0 }
  0x1d   :  { %388 = vmatprep.subr.bf16.mxu1 %v433_v0 }
  0x1f   :  { %407 = vmatpush3.bf16.msra.mxu0 %v431_v28 }
  0x20   :  { %389 = vmatpush3.bf16.msra.mxu1 %v424_v11  ;;  %408 = vmatprep.subr.bf16.mxu0 %v433_v0 }
  0x23   :  { %409 = vmatpush3.bf16.msra.mxu0 %v432_v29 }
  0xd9   :  { %v116_v19 = vpop.f32.mrb[0].mxu0 }
  0xda   :  { %v117_v20 = vadd.f32 %v327_v18, %v116_v19  ;;  %v372_v21 = vpop.f32.mrb[1].mxu0 }
  0xdb   :  { %v119_v22 = vpop.f32.mrb[2].mxu0 }
  0xdc   :  { %v120_v23 = vadd.f32 %v327_v18, %v119_v22  ;;  %v373_v24 = vpop.f32.mrb[3].mxu0  ;;  %v123_v25 = vmax.f32 %v117_v20, 0.0 }
  0xde   :  { %v124_v26 = vmax.f32 %v120_v23, 0.0 }
  0xe0   :  { %v125_v27 = vpack.c.bf16 %v124_v26, %v123_v25 }
  0xe2   :  { %391 = vmatmul.mubr.bf16.vlgmr.msra.gmra.mrb[0].mxu1 %v125_v27 }
 0x1b5   :  { %v215_v31 = vpop.f32.mrb[0].mxu1 }
 0x1b6   :  { %v216_v32 = vadd.f32 %v330_v30, %v215_v31  ;;  %v392_v33 = vpop.f32.mrb[1].mxu1 }
 0x1b7   :  { %v218_v34 = vpop.f32.mrb[2].mxu1 }
 0x1b8   :  { %v219_v35 = vadd.f32 %v330_v30, %v218_v34  ;;  %v393_v36 = vpop.f32.mrb[3].mxu1  ;;  %v222_v37 = vmax.f32 %v216_v32, 0.0 }
 0x1ba   :  { %v223_v38 = vmax.f32 %v219_v35, 0.0 }
 0x1bc   :  { %v224_v39 = vpack.c.bf16 %v223_v38, %v222_v37 }
 0x1be   :  { %411 = vmatmul.mubr.bf16.vlgmr.msra.gmra.mrb[4].mxu0 %v224_v39 }
 0x291   :  { %v314_v41 = vpop.f32.mrb[4].mxu0 }
 0x292   :  { %v315_v42 = vadd.f32 %v339_v40, %v314_v41  ;;  %v412_v43 = vpop.f32.mrb[5].mxu0 }
 0x293   :  { %v317_v44 = vpop.f32.mrb[6].mxu0 }
 0x294   :  { %321 = vst.msk [vmem:[%s574_s7] sm:$0xff] %vm74_vm2, %v315_v42  ;;  %v318_v45 = vadd.f32 %v339_v40, %v317_v44  ;;  %v413_v46 = vpop.f32.mrb[7].mxu0 }
 0x296   :  { %322 = vst.msk [vmem:[%s574_s7 + $0x8] sm:$0xff] %vm74_vm2, %v318_v45 }

</bundles_post_ra>
